<compile_context>
chip_gen: v6e
topology: v6e:2x2x1
jax: 0.10.0
libtpu: 0.0.40
codegen_flags: <defaults>
</compile_context>

<pallas_src>
import jax
import jax.numpy as jnp
from jax import lax
from jax.experimental import pallas as pl
from jax.experimental.pallas import tpu as pltpu


# --------------------------------------------------------------------------
# Small helpers
# --------------------------------------------------------------------------
def _round_up(a, b):
    return (a + b - 1) // b * b


def _vmem_capacity_bytes():
    try:
        return int(pltpu.get_tpu_info().vmem_capacity_bytes)
    except Exception:
        return 64 * 1024 * 1024   # conservative fallback (v7x per-core VMEM)


def _pick_row_tile(m_pad, d, g8, budget):
    """Largest stage-1 row tile dividing m_pad whose pipeline footprint fits."""
    divisors = [tm for tm in (1024, 512, 256, 128, 64, 32, 16, 8) if m_pad % tm == 0]
    for tm in divisors:
        need = (2 * tm * d * 2                # double-buffered bf16 x tile
                + 2 * 2 * tm * (g8 // 2) * 4  # double-buffered f32 (2,tm,4H) out tile
                + 2 * d * g8 * 2              # resident bf16 weight (x2 buffers)
                + g8 * 4)                     # bias
        if need <= budget:
            return tm
    return divisors[-1] if divisors else m_pad


def _pick_time_tile(t, b, h, budget):
    """Largest recurrence time-chunk dividing T whose footprint fits."""
    for tt in (32, 16, 8, 4, 2, 1):
        if t % tt:
            continue
        need = (2 * tt * b * 4 * h * 4   # double-buffered gate chunk
                + 2 * tt * b * h * 4     # double-buffered output chunk
                + 2 * h * 4 * h * 4      # resident recurrent weight (x2 buffers)
                + 2 * b * h * 4)         # h/c scratch
        if need <= budget:
            return tt
    return 1


def _sigmoid(x):
    # exp on the EUP + approximate reciprocal (also EUP slot) instead of a
    # full-precision VPU divide (perf-review item).
    return pl.reciprocal(1.0 + jnp.exp(-x), approx=True)


# --------------------------------------------------------------------------
# Stage 1: fused bf16 input projection for both directions
#   (T*B, D) @ (D, 8H) + b  ->  dir-stacked gates (2, T*B, 4H) in f32
# --------------------------------------------------------------------------
def _input_proj_kernel(x_ref, w_ref, b_ref, o_ref):
    g4 = o_ref.shape[-1]
    y = (jnp.dot(x_ref[...], w_ref[...], preferred_element_type=jnp.float32)
         + b_ref[...])
    o_ref[0] = y[:, :g4]     # forward-direction gate pre-activations
    o_ref[1] = y[:, g4:]     # backward-direction gate pre-activations


# --------------------------------------------------------------------------
# Stage 2: time-chunked bidirectional recurrence
#   grid = (2 directions, T // TT chunks)
# --------------------------------------------------------------------------
def _blstm_recurrent_kernel(xg_ref, whh_ref, out_ref, h_ref, c_ref):
    # xg_ref : (TT, B, 4H)  input-projection gates for this direction's chunk
    # whh_ref: (H, 4H)      recurrent weights for this direction (resident)
    # out_ref: (TT, B, H)   hidden outputs for this chunk
    # h_ref, c_ref: (B, H)  persistent state (reset at each direction's first chunk)
    d = pl.program_id(0)
    tc = pl.program_id(1)
    tt = xg_ref.shape[0]
    hdim = h_ref.shape[-1]

    @pl.when(tc == 0)
    def _():
        h_ref[...] = jnp.zeros_like(h_ref)
        c_ref[...] = jnp.zeros_like(c_ref)

    whh = whh_ref[...]

    def step(s, carry):
        h, c = carry
        # forward (d==0) walks the chunk 0..TT-1; backward (d==1) walks TT-1..0
        # (and its chunks arrive in reverse time order via the index_map).
        li = s + d * (tt - 1 - 2 * s)
        # Single fused (B,H)@(H,4H) MXU push per step; gate order [i, f, g, o].
        gates = xg_ref[li] + jnp.dot(h, whh, preferred_element_type=jnp.float32)
        i = _sigmoid(gates[:, 0 * hdim:1 * hdim])
        f = _sigmoid(gates[:, 1 * hdim:2 * hdim])
        g = jnp.tanh(gates[:, 2 * hdim:3 * hdim])
        o = _sigmoid(gates[:, 3 * hdim:4 * hdim])
        c = f * c + i * g
        h = o * jnp.tanh(c)
        out_ref[li] = h.astype(out_ref.dtype)
        return h, c

    h_new, c_new = lax.fori_loop(0, tt, step, (h_ref[...], c_ref[...]), unroll=True)
    h_ref[...] = h_new
    c_ref[...] = c_new


# --------------------------------------------------------------------------
# Wrapper
# --------------------------------------------------------------------------
def blstm_forward(x, params):
    """x: (B, T, input_dim) -> (B, T, 2*H).  h0 = c0 = 0."""
    B, T, D = x.shape
    H = params["w_hh_f"].shape[0]
    G4, G8 = 4 * H, 8 * H

    vmem_cap = _vmem_capacity_bytes()
    vmem_limit = int(min(100 * 2**20, max(32 * 2**20, 0.75 * vmem_cap)))
    budget = vmem_limit - (4 << 20)

    # time-major, flattened rows
    x_tm = jnp.transpose(x, (1, 0, 2)).astype(jnp.float32)       # (T, B, D)
    M = T * B
    x2d = x_tm.reshape(M, D)
    M_pad = _round_up(M, 8)
    if M_pad != M:
        x2d = jnp.pad(x2d, ((0, M_pad - M), (0, 0)))

    # bf16 MXU operands; f32 accumulation + f32 bias/output inside the kernel.
    x2d_bf = x2d.astype(jnp.bfloat16)
    w_cat = jnp.concatenate([params["w_ih_f"], params["w_ih_b"]],
                            axis=1).astype(jnp.bfloat16)          # (D, 8H)
    b_cat = jnp.concatenate(
        [params["b_ih_f"] + params["b_hh_f"],
         params["b_ih_b"] + params["b_hh_b"]])[None, :].astype(jnp.float32)  # (1, 8H)

    TM = _pick_row_tile(M_pad, D, G8, budget)

    xg = pl.pallas_call(
        _input_proj_kernel,
        out_shape=jax.ShapeDtypeStruct((2, M_pad, G4), jnp.float32),
        grid_spec=pltpu.PrefetchScalarGridSpec(
            num_scalar_prefetch=0,
            grid=(M_pad // TM,),
            in_specs=[
                pl.BlockSpec((TM, D), lambda i: (i, 0)),
                pl.BlockSpec((D, G8), lambda i: (0, 0)),   # weight stays resident
                pl.BlockSpec((1, G8), lambda i: (0, 0)),   # bias stays resident
            ],
            out_specs=pl.BlockSpec((2, TM, G4), lambda i: (0, i, 0)),
        ),
        compiler_params=pltpu.CompilerParams(
            dimension_semantics=("parallel",),
            vmem_limit_bytes=vmem_limit,
        ),
    )(x2d_bf, w_cat, b_cat)

    if M_pad != M:
        xg = xg[:, :M]
    xg = xg.reshape(2, T, B, G4)            # pure reshape — no transpose / HBM pass

    # Dir-stacked recurrent weights (2, H, 4H); one fused dot per step.
    whh = jnp.stack([params["w_hh_f"], params["w_hh_b"]]).astype(jnp.float32)

    TT = _pick_time_tile(T, B, H, budget)
    n_chunks = T // TT

    # chunk index: tc for the forward direction, n_chunks-1-tc for the backward one
    def _chunk_map(d, tc):
        return (d, tc + d * (n_chunks - 1 - 2 * tc), 0, 0)

    out = pl.pallas_call(
        _blstm_recurrent_kernel,
        out_shape=jax.ShapeDtypeStruct((2, T, B, H), jnp.float32),
        grid_spec=pltpu.PrefetchScalarGridSpec(
            num_scalar_prefetch=0,
            grid=(2, n_chunks),
            in_specs=[
                pl.BlockSpec((None, TT, B, G4), _chunk_map),
                pl.BlockSpec((None, H, G4), lambda d, tc: (d, 0, 0)),  # resident
            ],
            out_specs=pl.BlockSpec((None, TT, B, H), _chunk_map),
            scratch_shapes=[pltpu.VMEM((B, H), jnp.float32),
                            pltpu.VMEM((B, H), jnp.float32)],
        ),
        compiler_params=pltpu.CompilerParams(
            # dir axis parallel (2 TCs on v7x), time axis is a true recurrence
            dimension_semantics=("parallel", "arbitrary"),
            vmem_limit_bytes=vmem_limit,
        ),
    )(xg, whh)

    # (2, T, B, H) -> (B, T, 2H): forward then backward halves, like torch bi-LSTM.
    return jnp.transpose(out, (2, 1, 0, 3)).reshape(B, T, 2 * H)


# --------------------------------------------------------------------------
# Parameter init (PyTorch LSTM default: uniform(-1/sqrt(H), 1/sqrt(H)))
# --------------------------------------------------------------------------
def init_blstm_params(key, input_dim, output_dim):
    assert output_dim % 2 == 0
    H = output_dim // 2
    bound = 1.0 / float(H) ** 0.5
    keys = jax.random.split(key, 8)

    def u(k, shape):
        return jax.random.uniform(k, shape, jnp.float32, minval=-bound, maxval=bound)

    return {
        # gate order along the 4H axis: [i, f, g, o]
        "w_ih_f": u(keys[0], (input_dim, 4 * H)),
        "w_hh_f": u(keys[1], (H, 4 * H)),
        "b_ih_f": u(keys[2], (4 * H,)),
        "b_hh_f": u(keys[3], (4 * H,)),
        "w_ih_b": u(keys[4], (input_dim, 4 * H)),
        "w_hh_b": u(keys[5], (H, 4 * H)),
        "b_ih_b": u(keys[6], (4 * H,)),
        "b_hh_b": u(keys[7], (4 * H,)),
    }


# --------------------------------------------------------------------------
# Pure-JAX reference of the PyTorch forward
# --------------------------------------------------------------------------
def blstm_reference(x, params):
    x_tm = jnp.transpose(x, (1, 0, 2)).astype(jnp.float32)   # (T, B, D)
    H = params["w_hh_f"].shape[0]
    Tn, Bn, _ = x_tm.shape
    hp = jax.lax.Precision.HIGHEST

    def run_dir(w_ih, w_hh, b, reverse):
        def step(carry, x_t):
            h, c = carry
            gates = (jnp.dot(x_t, w_ih, precision=hp)
                     + jnp.dot(h, w_hh, precision=hp) + b)
            i = jax.nn.sigmoid(gates[:, 0 * H:1 * H])
            f = jax.nn.sigmoid(gates[:, 1 * H:2 * H])
            g = jnp.tanh(gates[:, 2 * H:3 * H])
            o = jax.nn.sigmoid(gates[:, 3 * H:4 * H])
            c = f * c + i * g
            h = o * jnp.tanh(c)
            return (h, c), h

        init = (jnp.zeros((Bn, H), jnp.float32), jnp.zeros((Bn, H), jnp.float32))
        xs = x_tm[::-1] if reverse else x_tm
        _, hs = jax.lax.scan(step, init, xs)
        return hs[::-1] if reverse else hs

    hf = run_dir(params["w_ih_f"], params["w_hh_f"],
                 params["b_ih_f"] + params["b_hh_f"], reverse=False)
    hb = run_dir(params["w_ih_b"], params["w_hh_b"],
                 params["b_ih_b"] + params["b_hh_b"], reverse=True)
    out_tm = jnp.concatenate([hf, hb], axis=-1)
    return jnp.transpose(out_tm, (1, 0, 2))


if __name__ == "__main__":
    key = jax.random.PRNGKey(0)
    k_param, k_x = jax.random.split(key)

    BATCH, SEQ, IN_DIM, OUT_DIM = 2, 8, 32, 32   # OUT_DIM even -> hidden = 16/dir
    params = init_blstm_params(k_param, IN_DIM, OUT_DIM)
    x = jax.random.normal(k_x, (BATCH, SEQ, IN_DIM), dtype=jnp.float32)

    out = jax.jit(blstm_forward)(x, params)
    out = jax.block_until_ready(out)

    ref = blstm_reference(x, params)
    assert out.shape == (BATCH, SEQ, OUT_DIM)
    err = float(jnp.max(jnp.abs(out - ref)))
    # bf16 MXU operands in stage 1 (f32 accumulation) -> loosened tolerance.
    assert jnp.allclose(out, ref, atol=3e-2, rtol=3e-2), f"mismatch vs reference, max_err={err}"

    print("KERNEL_OK")
</pallas_src>

<mosaic_0001>
module attributes {stable_mosaic.version = 11 : i64} {
  func.func @_input_proj_kernel(%arg0: i32, %arg1: memref<16x32xbf16, #tpu.memory_space<vmem>>, %arg2: memref<32x128xbf16, #tpu.memory_space<vmem>>, %arg3: memref<1x128xf32, #tpu.memory_space<vmem>>, %arg4: memref<2x16x64xf32, #tpu.memory_space<vmem>>) attributes {dimension_semantics = [#tpu.dimension_semantics<parallel>], iteration_bounds = array<i64: 1>, scalar_prefetch = 0 : i64, scratch_operands = 0 : i64, tpu.core_type = #tpu.core_type<tc>, window_params = [{transform_indices = @transform_0, window_bounds = array<i64: 16, 32>}, {pipeline_mode = #tpu.pipeline_mode<synchronous>, transform_indices = @transform_1, window_bounds = array<i64: 32, 128>}, {pipeline_mode = #tpu.pipeline_mode<synchronous>, transform_indices = @transform_2, window_bounds = array<i64: 1, 128>}, {transform_indices = @transform_3, window_bounds = array<i64: 2, 16, 64>}]} {
    %c0 = arith.constant 0 : index
    %c0_0 = arith.constant 0 : index
    %0 = vector.load %arg1[%c0, %c0_0] : memref<16x32xbf16, #tpu.memory_space<vmem>>, vector<16x32xbf16>
    %c0_1 = arith.constant 0 : index
    %c0_2 = arith.constant 0 : index
    %1 = vector.load %arg2[%c0_1, %c0_2] : memref<32x128xbf16, #tpu.memory_space<vmem>>, vector<32x128xbf16>
    %cst = arith.constant dense<0.000000e+00> : vector<16x128xf32>
    %2 = tpu.matmul %0, %1, %cst {dimension_numbers = #tpu.dot_dimension_numbers<[1], [0], [0], [1], [0, 0, 1, 1], [], []>} : vector<16x32xbf16>, vector<32x128xbf16>, vector<16x128xf32> -> vector<16x128xf32>
    %c0_3 = arith.constant 0 : index
    %c0_4 = arith.constant 0 : index
    %3 = vector.load %arg3[%c0_3, %c0_4] : memref<1x128xf32, #tpu.memory_space<vmem>>, vector<1x128xf32>
    %4 = vector.broadcast %3 : vector<1x128xf32> to vector<16x128xf32>
    %5 = arith.addf %2, %4 : vector<16x128xf32>
    %6 = vector.extract_strided_slice %5 {offsets = [0, 0], sizes = [16, 64], strides = [1, 1]} : vector<16x128xf32> to vector<16x64xf32>
    %c0_5 = arith.constant 0 : index
    %c0_6 = arith.constant 0 : index
    %c0_7 = arith.constant 0 : index
    %7 = vector.load %arg4[%c0_5, %c0_6, %c0_7] : memref<2x16x64xf32, #tpu.memory_space<vmem>>, vector<1x16x64xf32>
    %8 = vector.shape_cast %7 : vector<1x16x64xf32> to vector<16x64xf32>
    %9 = vector.shape_cast %6 : vector<16x64xf32> to vector<1x16x64xf32>
    tpu.vector_store %arg4[%c0_5, %c0_6, %c0_7], %9 {strides = array<i32>} : memref<2x16x64xf32, #tpu.memory_space<vmem>>, vector<1x16x64xf32>,
    %10 = vector.extract_strided_slice %5 {offsets = [0, 64], sizes = [16, 64], strides = [1, 1]} : vector<16x128xf32> to vector<16x64xf32>
    %c1 = arith.constant 1 : index
    %c0_8 = arith.constant 0 : index
    %c0_9 = arith.constant 0 : index
    %11 = vector.load %arg4[%c1, %c0_8, %c0_9] : memref<2x16x64xf32, #tpu.memory_space<vmem>>, vector<1x16x64xf32>
    %12 = vector.shape_cast %11 : vector<1x16x64xf32> to vector<16x64xf32>
    %13 = vector.shape_cast %10 : vector<16x64xf32> to vector<1x16x64xf32>
    tpu.vector_store %arg4[%c1, %c0_8, %c0_9], %13 {strides = array<i32>} : memref<2x16x64xf32, #tpu.memory_space<vmem>>, vector<1x16x64xf32>,
    return
  }
  func.func @transform_0(%arg0: i32) -> (i32, i32) {
    %c0_i32 = arith.constant 0 : i32
    %c0_i32_0 = arith.constant 0 : i32
    return %arg0, %c0_i32 : i32, i32
  }
  func.func @transform_1(%arg0: i32) -> (i32, i32) {
    %c0_i32 = arith.constant 0 : i32
    %c0_i32_0 = arith.constant 0 : i32
    %c0_i32_1 = arith.constant 0 : i32
    return %c0_i32, %c0_i32_0 : i32, i32
  }
  func.func @transform_2(%arg0: i32) -> (i32, i32) {
    %c0_i32 = arith.constant 0 : i32
    %c0_i32_0 = arith.constant 0 : i32
    %c0_i32_1 = arith.constant 0 : i32
    return %c0_i32, %c0_i32_0 : i32, i32
  }
  func.func @transform_3(%arg0: i32) -> (i32, i32, i32) {
    %c0_i32 = arith.constant 0 : i32
    %c0_i32_0 = arith.constant 0 : i32
    %c0_i32_1 = arith.constant 0 : i32
    return %c0_i32, %arg0, %c0_i32_0 : i32, i32, i32
  }
}

module attributes {stable_mosaic.version = 11 : i64} {
  func.func @_blstm_recurrent_kernel(%arg0: i32, %arg1: i32, %arg2: memref<1x8x2x64xf32, #tpu.memory_space<vmem>>, %arg3: memref<1x16x64xf32, #tpu.memory_space<vmem>>, %arg4: memref<1x8x2x16xf32, #tpu.memory_space<vmem>>, %arg5: memref<2x16xf32, #tpu.memory_space<vmem>>, %arg6: memref<2x16xf32, #tpu.memory_space<vmem>>) attributes {dimension_semantics = [#tpu.dimension_semantics<parallel>, #tpu.dimension_semantics<arbitrary>], iteration_bounds = array<i64: 2, 1>, scalar_prefetch = 0 : i64, scratch_operands = 2 : i64, tpu.core_type = #tpu.core_type<tc>, window_params = [{transform_indices = @transform_0, window_bounds = array<i64: 1, 8, 2, 64>}, {transform_indices = @transform_1, window_bounds = array<i64: 1, 16, 64>}, {transform_indices = @transform_2, window_bounds = array<i64: 1, 8, 2, 16>}]} {
    %c0_i32 = arith.constant 0 : i32
    %0 = arith.cmpi eq, %arg1, %c0_i32 : i32
    %1 = arith.extui %0 : i1 to i32
    %c0_i32_0 = arith.constant 0 : i32
    %2 = arith.cmpi ne, %1, %c0_i32_0 : i32
    scf.if %2 {
      %cst_131 = arith.constant 0.000000e+00 : f32
      %337 = vector.broadcast %cst_131 : f32 to vector<2x16xf32>
      %c0_132 = arith.constant 0 : index
      %c0_133 = arith.constant 0 : index
      %338 = vector.load %arg5[%c0_132, %c0_133] : memref<2x16xf32, #tpu.memory_space<vmem>>, vector<2x16xf32>
      tpu.vector_store %arg5[%c0_132, %c0_133], %337 {strides = array<i32>} : memref<2x16xf32, #tpu.memory_space<vmem>>, vector<2x16xf32>,
      %cst_134 = arith.constant 0.000000e+00 : f32
      %339 = vector.broadcast %cst_134 : f32 to vector<2x16xf32>
      %c0_135 = arith.constant 0 : index
      %c0_136 = arith.constant 0 : index
      %340 = vector.load %arg6[%c0_135, %c0_136] : memref<2x16xf32, #tpu.memory_space<vmem>>, vector<2x16xf32>
      tpu.vector_store %arg6[%c0_135, %c0_136], %339 {strides = array<i32>} : memref<2x16xf32, #tpu.memory_space<vmem>>, vector<2x16xf32>,
    } else {
    }
    %c0 = arith.constant 0 : index
    %c0_1 = arith.constant 0 : index
    %c0_2 = arith.constant 0 : index
    %3 = vector.load %arg3[%c0, %c0_1, %c0_2] : memref<1x16x64xf32, #tpu.memory_space<vmem>>, vector<1x16x64xf32>
    %4 = vector.shape_cast %3 : vector<1x16x64xf32> to vector<16x64xf32>
    %c0_3 = arith.constant 0 : index
    %c0_4 = arith.constant 0 : index
    %5 = vector.load %arg5[%c0_3, %c0_4] : memref<2x16xf32, #tpu.memory_space<vmem>>, vector<2x16xf32>
    %c0_5 = arith.constant 0 : index
    %c0_6 = arith.constant 0 : index
    %6 = vector.load %arg6[%c0_5, %c0_6] : memref<2x16xf32, #tpu.memory_space<vmem>>, vector<2x16xf32>
    %c0_i32_7 = arith.constant 0 : i32
    %c2_i32 = arith.constant 2 : i32
    %7 = arith.muli %c2_i32, %c0_i32_7 : i32
    %c7_i32 = arith.constant 7 : i32
    %8 = arith.subi %c7_i32, %7 : i32
    %9 = arith.muli %arg0, %8 : i32
    %10 = arith.addi %c0_i32_7, %9 : i32
    %c0_8 = arith.constant 0 : index
    %11 = arith.index_cast %10 : i32 to index
    %c0_9 = arith.constant 0 : index
    %c0_10 = arith.constant 0 : index
    %12 = vector.load %arg2[%c0_8, %11, %c0_9, %c0_10] : memref<1x8x2x64xf32, #tpu.memory_space<vmem>>, vector<1x1x2x64xf32>
    %13 = vector.shape_cast %12 : vector<1x1x2x64xf32> to vector<2x64xf32>
    %cst = arith.constant dense<0.000000e+00> : vector<2x64xf32>
    %14 = tpu.matmul %5, %4, %cst {dimension_numbers = #tpu.dot_dimension_numbers<[1], [0], [0], [1], [0, 0, 1, 1], [], []>} : vector<2x16xf32>, vector<16x64xf32>, vector<2x64xf32> -> vector<2x64xf32>
    %15 = arith.addf %13, %14 : vector<2x64xf32>
    %16 = vector.extract_strided_slice %15 {offsets = [0, 0], sizes = [2, 16], strides = [1, 1]} : vector<2x64xf32> to vector<2x16xf32>
    %cst_11 = arith.constant 0.000000e+00 : f32
    %17 = vector.broadcast %cst_11 : f32 to vector<2x16xf32>
    %18 = arith.subf %17, %16 : vector<2x16xf32>
    %19 = math.exp %18 : vector<2x16xf32>
    %cst_12 = arith.constant 1.000000e+00 : f32
    %20 = vector.broadcast %cst_12 : f32 to vector<2x16xf32>
    %21 = arith.addf %20, %19 : vector<2x16xf32>
    %22 = tpu.reciprocal %21 {approx = true} : vector<2x16xf32> -> vector<2x16xf32>
    %23 = vector.extract_strided_slice %15 {offsets = [0, 16], sizes = [2, 16], strides = [1, 1]} : vector<2x64xf32> to vector<2x16xf32>
    %cst_13 = arith.constant 0.000000e+00 : f32
    %24 = vector.broadcast %cst_13 : f32 to vector<2x16xf32>
    %25 = arith.subf %24, %23 : vector<2x16xf32>
    %26 = math.exp %25 : vector<2x16xf32>
    %cst_14 = arith.constant 1.000000e+00 : f32
    %27 = vector.broadcast %cst_14 : f32 to vector<2x16xf32>
    %28 = arith.addf %27, %26 : vector<2x16xf32>
    %29 = tpu.reciprocal %28 {approx = true} : vector<2x16xf32> -> vector<2x16xf32>
    %30 = vector.extract_strided_slice %15 {offsets = [0, 32], sizes = [2, 16], strides = [1, 1]} : vector<2x64xf32> to vector<2x16xf32>
    %31 = math.tanh %30 : vector<2x16xf32>
    %32 = vector.extract_strided_slice %15 {offsets = [0, 48], sizes = [2, 16], strides = [1, 1]} : vector<2x64xf32> to vector<2x16xf32>
    %cst_15 = arith.constant 0.000000e+00 : f32
    %33 = vector.broadcast %cst_15 : f32 to vector<2x16xf32>
    %34 = arith.subf %33, %32 : vector<2x16xf32>
    %35 = math.exp %34 : vector<2x16xf32>
    %cst_16 = arith.constant 1.000000e+00 : f32
    %36 = vector.broadcast %cst_16 : f32 to vector<2x16xf32>
    %37 = arith.addf %36, %35 : vector<2x16xf32>
    %38 = tpu.reciprocal %37 {approx = true} : vector<2x16xf32> -> vector<2x16xf32>
    %39 = arith.mulf %29, %6 : vector<2x16xf32>
    %40 = arith.mulf %22, %31 : vector<2x16xf32>
    %41 = arith.addf %39, %40 : vector<2x16xf32>
    %42 = math.tanh %41 : vector<2x16xf32>
    %43 = arith.mulf %38, %42 : vector<2x16xf32>
    %c0_17 = arith.constant 0 : index
    %44 = arith.index_cast %10 : i32 to index
    %c0_18 = arith.constant 0 : index
    %c0_19 = arith.constant 0 : index
    %45 = vector.load %arg4[%c0_17, %44, %c0_18, %c0_19] : memref<1x8x2x16xf32, #tpu.memory_space<vmem>>, vector<1x1x2x16xf32>
    %46 = vector.shape_cast %45 : vector<1x1x2x16xf32> to vector<2x16xf32>
    %47 = vector.shape_cast %43 : vector<2x16xf32> to vector<1x1x2x16xf32>
    tpu.vector_store %arg4[%c0_17, %44, %c0_18, %c0_19], %47 {strides = array<i32>} : memref<1x8x2x16xf32, #tpu.memory_space<vmem>>, vector<1x1x2x16xf32>,
    %c1_i32 = arith.constant 1 : i32
    %c2_i32_20 = arith.constant 2 : i32
    %48 = arith.muli %c2_i32_20, %c1_i32 : i32
    %c7_i32_21 = arith.constant 7 : i32
    %49 = arith.subi %c7_i32_21, %48 : i32
    %50 = arith.muli %arg0, %49 : i32
    %51 = arith.addi %c1_i32, %50 : i32
    %c0_22 = arith.constant 0 : index
    %52 = arith.index_cast %51 : i32 to index
    %c0_23 = arith.constant 0 : index
    %c0_24 = arith.constant 0 : index
    %53 = vector.load %arg2[%c0_22, %52, %c0_23, %c0_24] : memref<1x8x2x64xf32, #tpu.memory_space<vmem>>, vector<1x1x2x64xf32>
    %54 = vector.shape_cast %53 : vector<1x1x2x64xf32> to vector<2x64xf32>
    %cst_25 = arith.constant dense<0.000000e+00> : vector<2x64xf32>
    %55 = tpu.matmul %43, %4, %cst_25 {dimension_numbers = #tpu.dot_dimension_numbers<[1], [0], [0], [1], [0, 0, 1, 1], [], []>} : vector<2x16xf32>, vector<16x64xf32>, vector<2x64xf32> -> vector<2x64xf32>
    %56 = arith.addf %54, %55 : vector<2x64xf32>
    %57 = vector.extract_strided_slice %56 {offsets = [0, 0], sizes = [2, 16], strides = [1, 1]} : vector<2x64xf32> to vector<2x16xf32>
    %cst_26 = arith.constant 0.000000e+00 : f32
    %58 = vector.broadcast %cst_26 : f32 to vector<2x16xf32>
    %59 = arith.subf %58, %57 : vector<2x16xf32>
    %60 = math.exp %59 : vector<2x16xf32>
    %cst_27 = arith.constant 1.000000e+00 : f32
    %61 = vector.broadcast %cst_27 : f32 to vector<2x16xf32>
    %62 = arith.addf %61, %60 : vector<2x16xf32>
    %63 = tpu.reciprocal %62 {approx = true} : vector<2x16xf32> -> vector<2x16xf32>
    %64 = vector.extract_strided_slice %56 {offsets = [0, 16], sizes = [2, 16], strides = [1, 1]} : vector<2x64xf32> to vector<2x16xf32>
    %cst_28 = arith.constant 0.000000e+00 : f32
    %65 = vector.broadcast %cst_28 : f32 to vector<2x16xf32>
    %66 = arith.subf %65, %64 : vector<2x16xf32>
    %67 = math.exp %66 : vector<2x16xf32>
    %cst_29 = arith.constant 1.000000e+00 : f32
    %68 = vector.broadcast %cst_29 : f32 to vector<2x16xf32>
    %69 = arith.addf %68, %67 : vector<2x16xf32>
    %70 = tpu.reciprocal %69 {approx = true} : vector<2x16xf32> -> vector<2x16xf32>
    %71 = vector.extract_strided_slice %56 {offsets = [0, 32], sizes = [2, 16], strides = [1, 1]} : vector<2x64xf32> to vector<2x16xf32>
    %72 = math.tanh %71 : vector<2x16xf32>
    %73 = vector.extract_strided_slice %56 {offsets = [0, 48], sizes = [2, 16], strides = [1, 1]} : vector<2x64xf32> to vector<2x16xf32>
    %cst_30 = arith.constant 0.000000e+00 : f32
    %74 = vector.broadcast %cst_30 : f32 to vector<2x16xf32>
    %75 = arith.subf %74, %73 : vector<2x16xf32>
    %76 = math.exp %75 : vector<2x16xf32>
    %cst_31 = arith.constant 1.000000e+00 : f32
    %77 = vector.broadcast %cst_31 : f32 to vector<2x16xf32>
    %78 = arith.addf %77, %76 : vector<2x16xf32>
    %79 = tpu.reciprocal %78 {approx = true} : vector<2x16xf32> -> vector<2x16xf32>
    %80 = arith.mulf %70, %41 : vector<2x16xf32>
    %81 = arith.mulf %63, %72 : vector<2x16xf32>
    %82 = arith.addf %80, %81 : vector<2x16xf32>
    %83 = math.tanh %82 : vector<2x16xf32>
    %84 = arith.mulf %79, %83 : vector<2x16xf32>
    %c0_32 = arith.constant 0 : index
    %85 = arith.index_cast %51 : i32 to index
    %c0_33 = arith.constant 0 : index
    %c0_34 = arith.constant 0 : index
    %86 = vector.load %arg4[%c0_32, %85, %c0_33, %c0_34] : memref<1x8x2x16xf32, #tpu.memory_space<vmem>>, vector<1x1x2x16xf32>
    %87 = vector.shape_cast %86 : vector<1x1x2x16xf32> to vector<2x16xf32>
    %88 = vector.shape_cast %84 : vector<2x16xf32> to vector<1x1x2x16xf32>
    tpu.vector_store %arg4[%c0_32, %85, %c0_33, %c0_34], %88 {strides = array<i32>} : memref<1x8x2x16xf32, #tpu.memory_space<vmem>>, vector<1x1x2x16xf32>,
    %c2_i32_35 = arith.constant 2 : i32
    %c2_i32_36 = arith.constant 2 : i32
    %89 = arith.muli %c2_i32_36, %c2_i32_35 : i32
    %c7_i32_37 = arith.constant 7 : i32
    %90 = arith.subi %c7_i32_37, %89 : i32
    %91 = arith.muli %arg0, %90 : i32
    %92 = arith.addi %c2_i32_35, %91 : i32
    %c0_38 = arith.constant 0 : index
    %93 = arith.index_cast %92 : i32 to index
    %c0_39 = arith.constant 0 : index
    %c0_40 = arith.constant 0 : index
    %94 = vector.load %arg2[%c0_38, %93, %c0_39, %c0_40] : memref<1x8x2x64xf32, #tpu.memory_space<vmem>>, vector<1x1x2x64xf32>
    %95 = vector.shape_cast %94 : vector<1x1x2x64xf32> to vector<2x64xf32>
    %cst_41 = arith.constant dense<0.000000e+00> : vector<2x64xf32>
    %96 = tpu.matmul %84, %4, %cst_41 {dimension_numbers = #tpu.dot_dimension_numbers<[1], [0], [0], [1], [0, 0, 1, 1], [], []>} : vector<2x16xf32>, vector<16x64xf32>, vector<2x64xf32> -> vector<2x64xf32>
    %97 = arith.addf %95, %96 : vector<2x64xf32>
    %98 = vector.extract_strided_slice %97 {offsets = [0, 0], sizes = [2, 16], strides = [1, 1]} : vector<2x64xf32> to vector<2x16xf32>
    %cst_42 = arith.constant 0.000000e+00 : f32
    %99 = vector.broadcast %cst_42 : f32 to vector<2x16xf32>
    %100 = arith.subf %99, %98 : vector<2x16xf32>
    %101 = math.exp %100 : vector<2x16xf32>
    %cst_43 = arith.constant 1.000000e+00 : f32
    %102 = vector.broadcast %cst_43 : f32 to vector<2x16xf32>
    %103 = arith.addf %102, %101 : vector<2x16xf32>
    %104 = tpu.reciprocal %103 {approx = true} : vector<2x16xf32> -> vector<2x16xf32>
    %105 = vector.extract_strided_slice %97 {offsets = [0, 16], sizes = [2, 16], strides = [1, 1]} : vector<2x64xf32> to vector<2x16xf32>
    %cst_44 = arith.constant 0.000000e+00 : f32
    %106 = vector.broadcast %cst_44 : f32 to vector<2x16xf32>
    %107 = arith.subf %106, %105 : vector<2x16xf32>
    %108 = math.exp %107 : vector<2x16xf32>
    %cst_45 = arith.constant 1.000000e+00 : f32
    %109 = vector.broadcast %cst_45 : f32 to vector<2x16xf32>
    %110 = arith.addf %109, %108 : vector<2x16xf32>
    %111 = tpu.reciprocal %110 {approx = true} : vector<2x16xf32> -> vector<2x16xf32>
    %112 = vector.extract_strided_slice %97 {offsets = [0, 32], sizes = [2, 16], strides = [1, 1]} : vector<2x64xf32> to vector<2x16xf32>
    %113 = math.tanh %112 : vector<2x16xf32>
    %114 = vector.extract_strided_slice %97 {offsets = [0, 48], sizes = [2, 16], strides = [1, 1]} : vector<2x64xf32> to vector<2x16xf32>
    %cst_46 = arith.constant 0.000000e+00 : f32
    %115 = vector.broadcast %cst_46 : f32 to vector<2x16xf32>
    %116 = arith.subf %115, %114 : vector<2x16xf32>
    %117 = math.exp %116 : vector<2x16xf32>
    %cst_47 = arith.constant 1.000000e+00 : f32
    %118 = vector.broadcast %cst_47 : f32 to vector<2x16xf32>
    %119 = arith.addf %118, %117 : vector<2x16xf32>
    %120 = tpu.reciprocal %119 {approx = true} : vector<2x16xf32> -> vector<2x16xf32>
    %121 = arith.mulf %111, %82 : vector<2x16xf32>
    %122 = arith.mulf %104, %113 : vector<2x16xf32>
    %123 = arith.addf %121, %122 : vector<2x16xf32>
    %124 = math.tanh %123 : vector<2x16xf32>
    %125 = arith.mulf %120, %124 : vector<2x16xf32>
    %c0_48 = arith.constant 0 : index
    %126 = arith.index_cast %92 : i32 to index
    %c0_49 = arith.constant 0 : index
    %c0_50 = arith.constant 0 : index
    %127 = vector.load %arg4[%c0_48, %126, %c0_49, %c0_50] : memref<1x8x2x16xf32, #tpu.memory_space<vmem>>, vector<1x1x2x16xf32>
    %128 = vector.shape_cast %127 : vector<1x1x2x16xf32> to vector<2x16xf32>
    %129 = vector.shape_cast %125 : vector<2x16xf32> to vector<1x1x2x16xf32>
    tpu.vector_store %arg4[%c0_48, %126, %c0_49, %c0_50], %129 {strides = array<i32>} : memref<1x8x2x16xf32, #tpu.memory_space<vmem>>, vector<1x1x2x16xf32>,
    %c3_i32 = arith.constant 3 : i32
    %c2_i32_51 = arith.constant 2 : i32
    %130 = arith.muli %c2_i32_51, %c3_i32 : i32
    %c7_i32_52 = arith.constant 7 : i32
    %131 = arith.subi %c7_i32_52, %130 : i32
    %132 = arith.muli %arg0, %131 : i32
    %133 = arith.addi %c3_i32, %132 : i32
    %c0_53 = arith.constant 0 : index
    %134 = arith.index_cast %133 : i32 to index
    %c0_54 = arith.constant 0 : index
    %c0_55 = arith.constant 0 : index
    %135 = vector.load %arg2[%c0_53, %134, %c0_54, %c0_55] : memref<1x8x2x64xf32, #tpu.memory_space<vmem>>, vector<1x1x2x64xf32>
    %136 = vector.shape_cast %135 : vector<1x1x2x64xf32> to vector<2x64xf32>
    %cst_56 = arith.constant dense<0.000000e+00> : vector<2x64xf32>
    %137 = tpu.matmul %125, %4, %cst_56 {dimension_numbers = #tpu.dot_dimension_numbers<[1], [0], [0], [1], [0, 0, 1, 1], [], []>} : vector<2x16xf32>, vector<16x64xf32>, vector<2x64xf32> -> vector<2x64xf32>
    %138 = arith.addf %136, %137 : vector<2x64xf32>
    %139 = vector.extract_strided_slice %138 {offsets = [0, 0], sizes = [2, 16], strides = [1, 1]} : vector<2x64xf32> to vector<2x16xf32>
    %cst_57 = arith.constant 0.000000e+00 : f32
    %140 = vector.broadcast %cst_57 : f32 to vector<2x16xf32>
    %141 = arith.subf %140, %139 : vector<2x16xf32>
    %142 = math.exp %141 : vector<2x16xf32>
    %cst_58 = arith.constant 1.000000e+00 : f32
    %143 = vector.broadcast %cst_58 : f32 to vector<2x16xf32>
    %144 = arith.addf %143, %142 : vector<2x16xf32>
    %145 = tpu.reciprocal %144 {approx = true} : vector<2x16xf32> -> vector<2x16xf32>
    %146 = vector.extract_strided_slice %138 {offsets = [0, 16], sizes = [2, 16], strides = [1, 1]} : vector<2x64xf32> to vector<2x16xf32>
    %cst_59 = arith.constant 0.000000e+00 : f32
    %147 = vector.broadcast %cst_59 : f32 to vector<2x16xf32>
    %148 = arith.subf %147, %146 : vector<2x16xf32>
    %149 = math.exp %148 : vector<2x16xf32>
    %cst_60 = arith.constant 1.000000e+00 : f32
    %150 = vector.broadcast %cst_60 : f32 to vector<2x16xf32>
    %151 = arith.addf %150, %149 : vector<2x16xf32>
    %152 = tpu.reciprocal %151 {approx = true} : vector<2x16xf32> -> vector<2x16xf32>
    %153 = vector.extract_strided_slice %138 {offsets = [0, 32], sizes = [2, 16], strides = [1, 1]} : vector<2x64xf32> to vector<2x16xf32>
    %154 = math.tanh %153 : vector<2x16xf32>
    %155 = vector.extract_strided_slice %138 {offsets = [0, 48], sizes = [2, 16], strides = [1, 1]} : vector<2x64xf32> to vector<2x16xf32>
    %cst_61 = arith.constant 0.000000e+00 : f32
    %156 = vector.broadcast %cst_61 : f32 to vector<2x16xf32>
    %157 = arith.subf %156, %155 : vector<2x16xf32>
    %158 = math.exp %157 : vector<2x16xf32>
    %cst_62 = arith.constant 1.000000e+00 : f32
    %159 = vector.broadcast %cst_62 : f32 to vector<2x16xf32>
    %160 = arith.addf %159, %158 : vector<2x16xf32>
    %161 = tpu.reciprocal %160 {approx = true} : vector<2x16xf32> -> vector<2x16xf32>
    %162 = arith.mulf %152, %123 : vector<2x16xf32>
    %163 = arith.mulf %145, %154 : vector<2x16xf32>
    %164 = arith.addf %162, %163 : vector<2x16xf32>
    %165 = math.tanh %164 : vector<2x16xf32>
    %166 = arith.mulf %161, %165 : vector<2x16xf32>
    %c0_63 = arith.constant 0 : index
    %167 = arith.index_cast %133 : i32 to index
    %c0_64 = arith.constant 0 : index
    %c0_65 = arith.constant 0 : index
    %168 = vector.load %arg4[%c0_63, %167, %c0_64, %c0_65] : memref<1x8x2x16xf32, #tpu.memory_space<vmem>>, vector<1x1x2x16xf32>
    %169 = vector.shape_cast %168 : vector<1x1x2x16xf32> to vector<2x16xf32>
    %170 = vector.shape_cast %166 : vector<2x16xf32> to vector<1x1x2x16xf32>
    tpu.vector_store %arg4[%c0_63, %167, %c0_64, %c0_65], %170 {strides = array<i32>} : memref<1x8x2x16xf32, #tpu.memory_space<vmem>>, vector<1x1x2x16xf32>,
    %c4_i32 = arith.constant 4 : i32
    %c2_i32_66 = arith.constant 2 : i32
    %171 = arith.muli %c2_i32_66, %c4_i32 : i32
    %c7_i32_67 = arith.constant 7 : i32
    %172 = arith.subi %c7_i32_67, %171 : i32
    %173 = arith.muli %arg0, %172 : i32
    %174 = arith.addi %c4_i32, %173 : i32
    %c0_68 = arith.constant 0 : index
    %175 = arith.index_cast %174 : i32 to index
    %c0_69 = arith.constant 0 : index
    %c0_70 = arith.constant 0 : index
    %176 = vector.load %arg2[%c0_68, %175, %c0_69, %c0_70] : memref<1x8x2x64xf32, #tpu.memory_space<vmem>>, vector<1x1x2x64xf32>
    %177 = vector.shape_cast %176 : vector<1x1x2x64xf32> to vector<2x64xf32>
    %cst_71 = arith.constant dense<0.000000e+00> : vector<2x64xf32>
    %178 = tpu.matmul %166, %4, %cst_71 {dimension_numbers = #tpu.dot_dimension_numbers<[1], [0], [0], [1], [0, 0, 1, 1], [], []>} : vector<2x16xf32>, vector<16x64xf32>, vector<2x64xf32> -> vector<2x64xf32>
    %179 = arith.addf %177, %178 : vector<2x64xf32>
    %180 = vector.extract_strided_slice %179 {offsets = [0, 0], sizes = [2, 16], strides = [1, 1]} : vector<2x64xf32> to vector<2x16xf32>
    %cst_72 = arith.constant 0.000000e+00 : f32
    %181 = vector.broadcast %cst_72 : f32 to vector<2x16xf32>
    %182 = arith.subf %181, %180 : vector<2x16xf32>
    %183 = math.exp %182 : vector<2x16xf32>
    %cst_73 = arith.constant 1.000000e+00 : f32
    %184 = vector.broadcast %cst_73 : f32 to vector<2x16xf32>
    %185 = arith.addf %184, %183 : vector<2x16xf32>
    %186 = tpu.reciprocal %185 {approx = true} : vector<2x16xf32> -> vector<2x16xf32>
    %187 = vector.extract_strided_slice %179 {offsets = [0, 16], sizes = [2, 16], strides = [1, 1]} : vector<2x64xf32> to vector<2x16xf32>
    %cst_74 = arith.constant 0.000000e+00 : f32
    %188 = vector.broadcast %cst_74 : f32 to vector<2x16xf32>
    %189 = arith.subf %188, %187 : vector<2x16xf32>
    %190 = math.exp %189 : vector<2x16xf32>
    %cst_75 = arith.constant 1.000000e+00 : f32
    %191 = vector.broadcast %cst_75 : f32 to vector<2x16xf32>
    %192 = arith.addf %191, %190 : vector<2x16xf32>
    %193 = tpu.reciprocal %192 {approx = true} : vector<2x16xf32> -> vector<2x16xf32>
    %194 = vector.extract_strided_slice %179 {offsets = [0, 32], sizes = [2, 16], strides = [1, 1]} : vector<2x64xf32> to vector<2x16xf32>
    %195 = math.tanh %194 : vector<2x16xf32>
    %196 = vector.extract_strided_slice %179 {offsets = [0, 48], sizes = [2, 16], strides = [1, 1]} : vector<2x64xf32> to vector<2x16xf32>
    %cst_76 = arith.constant 0.000000e+00 : f32
    %197 = vector.broadcast %cst_76 : f32 to vector<2x16xf32>
    %198 = arith.subf %197, %196 : vector<2x16xf32>
    %199 = math.exp %198 : vector<2x16xf32>
    %cst_77 = arith.constant 1.000000e+00 : f32
    %200 = vector.broadcast %cst_77 : f32 to vector<2x16xf32>
    %201 = arith.addf %200, %199 : vector<2x16xf32>
    %202 = tpu.reciprocal %201 {approx = true} : vector<2x16xf32> -> vector<2x16xf32>
    %203 = arith.mulf %193, %164 : vector<2x16xf32>
    %204 = arith.mulf %186, %195 : vector<2x16xf32>
    %205 = arith.addf %203, %204 : vector<2x16xf32>
    %206 = math.tanh %205 : vector<2x16xf32>
    %207 = arith.mulf %202, %206 : vector<2x16xf32>
    %c0_78 = arith.constant 0 : index
    %208 = arith.index_cast %174 : i32 to index
    %c0_79 = arith.constant 0 : index
    %c0_80 = arith.constant 0 : index
    %209 = vector.load %arg4[%c0_78, %208, %c0_79, %c0_80] : memref<1x8x2x16xf32, #tpu.memory_space<vmem>>, vector<1x1x2x16xf32>
    %210 = vector.shape_cast %209 : vector<1x1x2x16xf32> to vector<2x16xf32>
    %211 = vector.shape_cast %207 : vector<2x16xf32> to vector<1x1x2x16xf32>
    tpu.vector_store %arg4[%c0_78, %208, %c0_79, %c0_80], %211 {strides = array<i32>} : memref<1x8x2x16xf32, #tpu.memory_space<vmem>>, vector<1x1x2x16xf32>,
    %c5_i32 = arith.constant 5 : i32
    %c2_i32_81 = arith.constant 2 : i32
    %212 = arith.muli %c2_i32_81, %c5_i32 : i32
    %c7_i32_82 = arith.constant 7 : i32
    %213 = arith.subi %c7_i32_82, %212 : i32
    %214 = arith.muli %arg0, %213 : i32
    %215 = arith.addi %c5_i32, %214 : i32
    %c0_83 = arith.constant 0 : index
    %216 = arith.index_cast %215 : i32 to index
    %c0_84 = arith.constant 0 : index
    %c0_85 = arith.constant 0 : index
    %217 = vector.load %arg2[%c0_83, %216, %c0_84, %c0_85] : memref<1x8x2x64xf32, #tpu.memory_space<vmem>>, vector<1x1x2x64xf32>
    %218 = vector.shape_cast %217 : vector<1x1x2x64xf32> to vector<2x64xf32>
    %cst_86 = arith.constant dense<0.000000e+00> : vector<2x64xf32>
    %219 = tpu.matmul %207, %4, %cst_86 {dimension_numbers = #tpu.dot_dimension_numbers<[1], [0], [0], [1], [0, 0, 1, 1], [], []>} : vector<2x16xf32>, vector<16x64xf32>, vector<2x64xf32> -> vector<2x64xf32>
    %220 = arith.addf %218, %219 : vector<2x64xf32>
    %221 = vector.extract_strided_slice %220 {offsets = [0, 0], sizes = [2, 16], strides = [1, 1]} : vector<2x64xf32> to vector<2x16xf32>
    %cst_87 = arith.constant 0.000000e+00 : f32
    %222 = vector.broadcast %cst_87 : f32 to vector<2x16xf32>
    %223 = arith.subf %222, %221 : vector<2x16xf32>
    %224 = math.exp %223 : vector<2x16xf32>
    %cst_88 = arith.constant 1.000000e+00 : f32
    %225 = vector.broadcast %cst_88 : f32 to vector<2x16xf32>
    %226 = arith.addf %225, %224 : vector<2x16xf32>
    %227 = tpu.reciprocal %226 {approx = true} : vector<2x16xf32> -> vector<2x16xf32>
    %228 = vector.extract_strided_slice %220 {offsets = [0, 16], sizes = [2, 16], strides = [1, 1]} : vector<2x64xf32> to vector<2x16xf32>
    %cst_89 = arith.constant 0.000000e+00 : f32
    %229 = vector.broadcast %cst_89 : f32 to vector<2x16xf32>
    %230 = arith.subf %229, %228 : vector<2x16xf32>
    %231 = math.exp %230 : vector<2x16xf32>
    %cst_90 = arith.constant 1.000000e+00 : f32
    %232 = vector.broadcast %cst_90 : f32 to vector<2x16xf32>
    %233 = arith.addf %232, %231 : vector<2x16xf32>
    %234 = tpu.reciprocal %233 {approx = true} : vector<2x16xf32> -> vector<2x16xf32>
    %235 = vector.extract_strided_slice %220 {offsets = [0, 32], sizes = [2, 16], strides = [1, 1]} : vector<2x64xf32> to vector<2x16xf32>
    %236 = math.tanh %235 : vector<2x16xf32>
    %237 = vector.extract_strided_slice %220 {offsets = [0, 48], sizes = [2, 16], strides = [1, 1]} : vector<2x64xf32> to vector<2x16xf32>
    %cst_91 = arith.constant 0.000000e+00 : f32
    %238 = vector.broadcast %cst_91 : f32 to vector<2x16xf32>
    %239 = arith.subf %238, %237 : vector<2x16xf32>
    %240 = math.exp %239 : vector<2x16xf32>
    %cst_92 = arith.constant 1.000000e+00 : f32
    %241 = vector.broadcast %cst_92 : f32 to vector<2x16xf32>
    %242 = arith.addf %241, %240 : vector<2x16xf32>
    %243 = tpu.reciprocal %242 {approx = true} : vector<2x16xf32> -> vector<2x16xf32>
    %244 = arith.mulf %234, %205 : vector<2x16xf32>
    %245 = arith.mulf %227, %236 : vector<2x16xf32>
    %246 = arith.addf %244, %245 : vector<2x16xf32>
    %247 = math.tanh %246 : vector<2x16xf32>
    %248 = arith.mulf %243, %247 : vector<2x16xf32>
    %c0_93 = arith.constant 0 : index
    %249 = arith.index_cast %215 : i32 to index
    %c0_94 = arith.constant 0 : index
    %c0_95 = arith.constant 0 : index
    %250 = vector.load %arg4[%c0_93, %249, %c0_94, %c0_95] : memref<1x8x2x16xf32, #tpu.memory_space<vmem>>, vector<1x1x2x16xf32>
    %251 = vector.shape_cast %250 : vector<1x1x2x16xf32> to vector<2x16xf32>
    %252 = vector.shape_cast %248 : vector<2x16xf32> to vector<1x1x2x16xf32>
    tpu.vector_store %arg4[%c0_93, %249, %c0_94, %c0_95], %252 {strides = array<i32>} : memref<1x8x2x16xf32, #tpu.memory_space<vmem>>, vector<1x1x2x16xf32>,
    %c6_i32 = arith.constant 6 : i32
    %c2_i32_96 = arith.constant 2 : i32
    %253 = arith.muli %c2_i32_96, %c6_i32 : i32
    %c7_i32_97 = arith.constant 7 : i32
    %254 = arith.subi %c7_i32_97, %253 : i32
    %255 = arith.muli %arg0, %254 : i32
    %256 = arith.addi %c6_i32, %255 : i32
    %c0_98 = arith.constant 0 : index
    %257 = arith.index_cast %256 : i32 to index
    %c0_99 = arith.constant 0 : index
    %c0_100 = arith.constant 0 : index
    %258 = vector.load %arg2[%c0_98, %257, %c0_99, %c0_100] : memref<1x8x2x64xf32, #tpu.memory_space<vmem>>, vector<1x1x2x64xf32>
    %259 = vector.shape_cast %258 : vector<1x1x2x64xf32> to vector<2x64xf32>
    %cst_101 = arith.constant dense<0.000000e+00> : vector<2x64xf32>
    %260 = tpu.matmul %248, %4, %cst_101 {dimension_numbers = #tpu.dot_dimension_numbers<[1], [0], [0], [1], [0, 0, 1, 1], [], []>} : vector<2x16xf32>, vector<16x64xf32>, vector<2x64xf32> -> vector<2x64xf32>
    %261 = arith.addf %259, %260 : vector<2x64xf32>
    %262 = vector.extract_strided_slice %261 {offsets = [0, 0], sizes = [2, 16], strides = [1, 1]} : vector<2x64xf32> to vector<2x16xf32>
    %cst_102 = arith.constant 0.000000e+00 : f32
    %263 = vector.broadcast %cst_102 : f32 to vector<2x16xf32>
    %264 = arith.subf %263, %262 : vector<2x16xf32>
    %265 = math.exp %264 : vector<2x16xf32>
    %cst_103 = arith.constant 1.000000e+00 : f32
    %266 = vector.broadcast %cst_103 : f32 to vector<2x16xf32>
    %267 = arith.addf %266, %265 : vector<2x16xf32>
    %268 = tpu.reciprocal %267 {approx = true} : vector<2x16xf32> -> vector<2x16xf32>
    %269 = vector.extract_strided_slice %261 {offsets = [0, 16], sizes = [2, 16], strides = [1, 1]} : vector<2x64xf32> to vector<2x16xf32>
    %cst_104 = arith.constant 0.000000e+00 : f32
    %270 = vector.broadcast %cst_104 : f32 to vector<2x16xf32>
    %271 = arith.subf %270, %269 : vector<2x16xf32>
    %272 = math.exp %271 : vector<2x16xf32>
    %cst_105 = arith.constant 1.000000e+00 : f32
    %273 = vector.broadcast %cst_105 : f32 to vector<2x16xf32>
    %274 = arith.addf %273, %272 : vector<2x16xf32>
    %275 = tpu.reciprocal %274 {approx = true} : vector<2x16xf32> -> vector<2x16xf32>
    %276 = vector.extract_strided_slice %261 {offsets = [0, 32], sizes = [2, 16], strides = [1, 1]} : vector<2x64xf32> to vector<2x16xf32>
    %277 = math.tanh %276 : vector<2x16xf32>
    %278 = vector.extract_strided_slice %261 {offsets = [0, 48], sizes = [2, 16], strides = [1, 1]} : vector<2x64xf32> to vector<2x16xf32>
    %cst_106 = arith.constant 0.000000e+00 : f32
    %279 = vector.broadcast %cst_106 : f32 to vector<2x16xf32>
    %280 = arith.subf %279, %278 : vector<2x16xf32>
    %281 = math.exp %280 : vector<2x16xf32>
    %cst_107 = arith.constant 1.000000e+00 : f32
    %282 = vector.broadcast %cst_107 : f32 to vector<2x16xf32>
    %283 = arith.addf %282, %281 : vector<2x16xf32>
    %284 = tpu.reciprocal %283 {approx = true} : vector<2x16xf32> -> vector<2x16xf32>
    %285 = arith.mulf %275, %246 : vector<2x16xf32>
    %286 = arith.mulf %268, %277 : vector<2x16xf32>
    %287 = arith.addf %285, %286 : vector<2x16xf32>
    %288 = math.tanh %287 : vector<2x16xf32>
    %289 = arith.mulf %284, %288 : vector<2x16xf32>
    %c0_108 = arith.constant 0 : index
    %290 = arith.index_cast %256 : i32 to index
    %c0_109 = arith.constant 0 : index
    %c0_110 = arith.constant 0 : index
    %291 = vector.load %arg4[%c0_108, %290, %c0_109, %c0_110] : memref<1x8x2x16xf32, #tpu.memory_space<vmem>>, vector<1x1x2x16xf32>
    %292 = vector.shape_cast %291 : vector<1x1x2x16xf32> to vector<2x16xf32>
    %293 = vector.shape_cast %289 : vector<2x16xf32> to vector<1x1x2x16xf32>
    tpu.vector_store %arg4[%c0_108, %290, %c0_109, %c0_110], %293 {strides = array<i32>} : memref<1x8x2x16xf32, #tpu.memory_space<vmem>>, vector<1x1x2x16xf32>,
    %c7_i32_111 = arith.constant 7 : i32
    %c2_i32_112 = arith.constant 2 : i32
    %294 = arith.muli %c2_i32_112, %c7_i32_111 : i32
    %c7_i32_113 = arith.constant 7 : i32
    %295 = arith.subi %c7_i32_113, %294 : i32
    %296 = arith.muli %arg0, %295 : i32
    %297 = arith.addi %c7_i32_111, %296 : i32
    %c0_114 = arith.constant 0 : index
    %298 = arith.index_cast %297 : i32 to index
    %c0_115 = arith.constant 0 : index
    %c0_116 = arith.constant 0 : index
    %299 = vector.load %arg2[%c0_114, %298, %c0_115, %c0_116] : memref<1x8x2x64xf32, #tpu.memory_space<vmem>>, vector<1x1x2x64xf32>
    %300 = vector.shape_cast %299 : vector<1x1x2x64xf32> to vector<2x64xf32>
    %cst_117 = arith.constant dense<0.000000e+00> : vector<2x64xf32>
    %301 = tpu.matmul %289, %4, %cst_117 {dimension_numbers = #tpu.dot_dimension_numbers<[1], [0], [0], [1], [0, 0, 1, 1], [], []>} : vector<2x16xf32>, vector<16x64xf32>, vector<2x64xf32> -> vector<2x64xf32>
    %302 = arith.addf %300, %301 : vector<2x64xf32>
    %303 = vector.extract_strided_slice %302 {offsets = [0, 0], sizes = [2, 16], strides = [1, 1]} : vector<2x64xf32> to vector<2x16xf32>
    %cst_118 = arith.constant 0.000000e+00 : f32
    %304 = vector.broadcast %cst_118 : f32 to vector<2x16xf32>
    %305 = arith.subf %304, %303 : vector<2x16xf32>
    %306 = math.exp %305 : vector<2x16xf32>
    %cst_119 = arith.constant 1.000000e+00 : f32
    %307 = vector.broadcast %cst_119 : f32 to vector<2x16xf32>
    %308 = arith.addf %307, %306 : vector<2x16xf32>
    %309 = tpu.reciprocal %308 {approx = true} : vector<2x16xf32> -> vector<2x16xf32>
    %310 = vector.extract_strided_slice %302 {offsets = [0, 16], sizes = [2, 16], strides = [1, 1]} : vector<2x64xf32> to vector<2x16xf32>
    %cst_120 = arith.constant 0.000000e+00 : f32
    %311 = vector.broadcast %cst_120 : f32 to vector<2x16xf32>
    %312 = arith.subf %311, %310 : vector<2x16xf32>
    %313 = math.exp %312 : vector<2x16xf32>
    %cst_121 = arith.constant 1.000000e+00 : f32
    %314 = vector.broadcast %cst_121 : f32 to vector<2x16xf32>
    %315 = arith.addf %314, %313 : vector<2x16xf32>
    %316 = tpu.reciprocal %315 {approx = true} : vector<2x16xf32> -> vector<2x16xf32>
    %317 = vector.extract_strided_slice %302 {offsets = [0, 32], sizes = [2, 16], strides = [1, 1]} : vector<2x64xf32> to vector<2x16xf32>
    %318 = math.tanh %317 : vector<2x16xf32>
    %319 = vector.extract_strided_slice %302 {offsets = [0, 48], sizes = [2, 16], strides = [1, 1]} : vector<2x64xf32> to vector<2x16xf32>
    %cst_122 = arith.constant 0.000000e+00 : f32
    %320 = vector.broadcast %cst_122 : f32 to vector<2x16xf32>
    %321 = arith.subf %320, %319 : vector<2x16xf32>
    %322 = math.exp %321 : vector<2x16xf32>
    %cst_123 = arith.constant 1.000000e+00 : f32
    %323 = vector.broadcast %cst_123 : f32 to vector<2x16xf32>
    %324 = arith.addf %323, %322 : vector<2x16xf32>
    %325 = tpu.reciprocal %324 {approx = true} : vector<2x16xf32> -> vector<2x16xf32>
    %326 = arith.mulf %316, %287 : vector<2x16xf32>
    %327 = arith.mulf %309, %318 : vector<2x16xf32>
    %328 = arith.addf %326, %327 : vector<2x16xf32>
    %329 = math.tanh %328 : vector<2x16xf32>
    %330 = arith.mulf %325, %329 : vector<2x16xf32>
    %c0_124 = arith.constant 0 : index
    %331 = arith.index_cast %297 : i32 to index
    %c0_125 = arith.constant 0 : index
    %c0_126 = arith.constant 0 : index
    %332 = vector.load %arg4[%c0_124, %331, %c0_125, %c0_126] : memref<1x8x2x16xf32, #tpu.memory_space<vmem>>, vector<1x1x2x16xf32>
    %333 = vector.shape_cast %332 : vector<1x1x2x16xf32> to vector<2x16xf32>
    %334 = vector.shape_cast %330 : vector<2x16xf32> to vector<1x1x2x16xf32>
    tpu.vector_store %arg4[%c0_124, %331, %c0_125, %c0_126], %334 {strides = array<i32>} : memref<1x8x2x16xf32, #tpu.memory_space<vmem>>, vector<1x1x2x16xf32>,
    %c8_i32 = arith.constant 8 : i32
    %c0_127 = arith.constant 0 : index
    %c0_128 = arith.constant 0 : index
    %335 = vector.load %arg5[%c0_127, %c0_128] : memref<2x16xf32, #tpu.memory_space<vmem>>, vector<2x16xf32>
    tpu.vector_store %arg5[%c0_127, %c0_128], %330 {strides = array<i32>} : memref<2x16xf32, #tpu.memory_space<vmem>>, vector<2x16xf32>,
    %c0_129 = arith.constant 0 : index
    %c0_130 = arith.constant 0 : index
    %336 = vector.load %arg6[%c0_129, %c0_130] : memref<2x16xf32, #tpu.memory_space<vmem>>, vector<2x16xf32>
    tpu.vector_store %arg6[%c0_129, %c0_130], %328 {strides = array<i32>} : memref<2x16xf32, #tpu.memory_space<vmem>>, vector<2x16xf32>,
    return
  }
  func.func @transform_0(%arg0: i32, %arg1: i32) -> (i32, i32, i32, i32) {
    %c2_i32 = arith.constant 2 : i32
    %0 = arith.muli %c2_i32, %arg1 : i32
    %c0_i32 = arith.constant 0 : i32
    %1 = arith.subi %c0_i32, %0 : i32
    %2 = arith.muli %arg0, %1 : i32
    %3 = arith.addi %arg1, %2 : i32
    %c0_i32_0 = arith.constant 0 : i32
    %c0_i32_1 = arith.constant 0 : i32
    %c0_i32_2 = arith.constant 0 : i32
    return %arg0, %3, %c0_i32_0, %c0_i32_1 : i32, i32, i32, i32
  }
  func.func @transform_1(%arg0: i32, %arg1: i32) -> (i32, i32, i32) {
    %c0_i32 = arith.constant 0 : i32
    %c0_i32_0 = arith.constant 0 : i32
    %c0_i32_1 = arith.constant 0 : i32
    return %arg0, %c0_i32, %c0_i32_0 : i32, i32, i32
  }
  func.func @transform_2(%arg0: i32, %arg1: i32) -> (i32, i32, i32, i32) {
    %c2_i32 = arith.constant 2 : i32
    %0 = arith.muli %c2_i32, %arg1 : i32
    %c0_i32 = arith.constant 0 : i32
    %1 = arith.subi %c0_i32, %0 : i32
    %2 = arith.muli %arg0, %1 : i32
    %3 = arith.addi %arg1, %2 : i32
    %c0_i32_0 = arith.constant 0 : i32
    %c0_i32_1 = arith.constant 0 : i32
    %c0_i32_2 = arith.constant 0 : i32
    return %arg0, %3, %c0_i32_0, %c0_i32_1 : i32, i32, i32, i32
  }
}

</mosaic_0001>

<bundles_post_ra>
// kernel: blstm_forward.2
= control target key start
LH: loop header
LB: loop body
LE: loop exit
PB: predicated region body
PF: predicated region fallthrough
CT: control target
= control target key end

     0   :  { %v132_v0 = vmov 0.0   ;;  %vm133_vm0 = vmmov 0   ;;  %vm45_vm1 = vcmask 261120   ;;  %vm90_vm2 = vcmask 523264   ;;  %s179_s1 = inlined_call_operand.vmem [shape: bf16[32,128], index: 1, kind: input, shape index: {}]   ;;  %s180_s0 = inlined_call_operand.vmem [shape: bf16[16,32], index: 0, kind: input, shape index: {}]   ;;  %s181_s2 = inlined_call_operand.vmem [shape: f32[1,128], index: 2, kind: input, shape index: {}]   ;;  %s182_s3 = inlined_call_operand.vmem [shape: f32[2,16,64], index: 3, kind: output, shape index: {}]  }
   0x1   :  { %118 = vmatprep.subr.bf16.mxu0 %v132_v0  ;;  %v129_v1 = vld [vmem:[%s179_s1 + $0x8] sm:$0xff]   ;;  %122 = vmatprep.mubr.msk.bf16.mxu0 %vm133_vm0, %v132_v0  ;;  %v130_v2 = vld [vmem:[%s179_s1] sm:$0xff]   ;;  %s134_s1 = smov 64  }
   0x2   :  { %119 = vmatpush3.bf16.msra.mxu0 %v129_v1  ;;  %v131_v3 = vld [vmem:[%s180_s0] sm:$0xff]  }
   0x3   :  { %120 = vmatprep.subr.bf16.mxu0 %v132_v0  ;;  %v108_v4 = vld [vmem:[%s181_s2] ss:$0 sm:$0xff] }
   0x6   :  { %121 = vmatpush3.bf16.msra.mxu0 %v130_v2 }
   0x9   :  { %123 = vmatmul.mubr.msk.bf16.vlgmr.msra.gmra.mxu0 %vm45_vm1, %v131_v3 }
  0xc9   :  { %v83_v5 = vpop.f32.mrf.mxu0 }
  0xca   :  { %v84_v6 = vadd.f32 %v108_v4, %v83_v5 }
  0xcb   :  { %v124_v7 = vpop.f32.mrf.mxu0 }
  0xcc   :  { %91 = vst.msk [vmem:[%s182_s3] sm:$0xff] %vm90_vm2, %v84_v6  ;;  %95 = vrot.lane.b32.xlu0 %v84_v6, %s134_s1 }
  0xcd   :  { %v86_v8 = vpop.f32.mrf.mxu0 }
  0xce   :  { %v87_v9 = vadd.f32 %v108_v4, %v86_v8 }
  0xcf   :  { %v125_v10 = vpop.f32.mrf.mxu0 }
  0xd0   :  { %92 = vst.msk [vmem:[%s182_s3 + $0x8] sm:$0xff] %vm90_vm2, %v87_v9  ;;  %97 = vrot.lane.b32.xlu0 %v87_v9, %s134_s1 }
 0x13e   :  { %v96_v11 = vpop.permute.xlu0 %95 }
 0x13f   :  { %113 = vst.msk [vmem:[%s182_s3 + $0x10] sm:$0xff] %vm90_vm2, %v96_v11 }
 0x142   :  { %v98_v12 = vpop.permute.xlu0 %97 }
 0x143   :  { %114 = vst.msk [vmem:[%s182_s3 + $0x18] sm:$0xff] %vm90_vm2, %v98_v12 }

// kernel: blstm_forward.3
= control target key start
LH: loop header
LB: loop body
LE: loop exit
PB: predicated region body
PF: predicated region fallthrough
CT: control target
= control target key end

     0   :  { %s1564_s9 = smov 0   ;;  %s1566_s10 = smov 0   ;;  %s1756_s0 = inlined_call_operand.vmem [shape: f32[2,8,2,64], index: 0, kind: input, shape index: {}]   ;;  %s1757_s1 = inlined_call_operand.vmem [shape: f32[2,16,64], index: 1, kind: input, shape index: {}]   ;;  %s1758_s2 = inlined_call_operand.vmem [shape: f32[2,8,2,16], index: 2, kind: output, shape index: {}]  }
   0x1   :  { %s1568_s11 = smov 0  }
   0x2 LB: > { %s24_s12 = sadd.s32 1, %s1536_s10  ;;  %p1297_p0 = scmp.ge.s32.totalorder %s1540_s11, 1  ;;  %s1540_s11 = sphi %s1568_s11, %s12_s11   ;;  %s1536_s10 = sphi %s1566_s10, %s1760_s10   ;;  %s1532_s9 = sphi %s1564_s9, %s1759_s9  }
   0x3   : > { %p26_p1 = scmp.ge.s32.totalorder %s24_s12, 2  ;;  %p167_p2 = scmp.lt.s32.totalorder %s1540_s11, 3 }
   0x5   : > { %s1762_s12 = smov (%p26_p1, %s24_s12), 0  ;;  %p168_p3 = pnand %p1297_p0, %p167_p2 }
   0x6   : > { %p215_p4 = scmp.lt.s32.totalorder (!%p168_p3), %s1532_s9, 1  ;;  %s1304_s18 = smul.u32 (!%p168_p3), 14, %s1532_s9 }
   0x7   : > { %171 = sbr.rel (%p168_p3) target bundleno = 5534 (0x159e), region = 28  ;;  %s1544_s23 = smov (!%p168_p3), 96  }
   0x8   : > { %s1545_s24 = smov (!%p168_p3), 16   ;;  %s1546_s25 = smov (!%p168_p3), 32  }
   0x9   : > { %s1547_s26 = smov (!%p168_p3), 80   ;;  %s1306_s3 = smul.u32 (!%p168_p3), 10, %s1532_s9 }
   0xa   : > { %s1311_s6 = smul.u32 (!%p168_p3), 6, %s1532_s9  ;;  %s695_s16 = ssub.s32 (!%p168_p3), 4, %s1532_s9 }
   0xb   : > { %s1323_s20 = smul.u32 (!%p168_p3), 4294967290, %s1532_s9 }
   0xc   : > { %vm255_vm0 = vcmask 123904   ;;  %v1542_v0 = vmov 0.0   ;;  %vm1543_vm1 = vmmov 0   ;;  %s216_s13 = scalar_select %p215_p4, %s1532_s9, 1  ;;  %vm266_vm2 = vcmask 130048  }
   0xd   : > { %1367 = vmatprep.subr.mxu0 %v1542_v0  ;;  %1371 = vmatprep.mubr.msk.f32.mxu0 %vm1543_vm1, %v1542_v0  ;;  %256 = vst.msk [vmem:[#allocation2] sm:$0x3] %vm255_vm0, %v1542_v0  ;;  %257 = vst.msk [vmem:[#allocation3] sm:$0x3] %vm255_vm0, %v1542_v0  ;;  %s1328_s28 = smul.u32 4294967286, %s1532_s9 }
   0xe   : > { %1374 = vmatprep.subr.mxu1 %v1542_v0  ;;  %1378 = vmatprep.mubr.msk.f32.mxu1 %vm1543_vm1, %v1542_v0  ;;  %s1596_s14 = sshll.u32 %s216_s13, 4  ;;  %s1316_s13 = sshll.u32 %s1532_s9, 1 }
   0xf   : > { %s232_s17 = scalar_lea.vmem %s1757_s1, %s1596_s14  ;;  %s1626_s21 = scalar_lea.vmem %s1756_s0, %s1596_s14 }
  0x10   : > { %v1602_v1 = vld [vmem:[%s232_s17 + $0x8] sm:$0xff]  ;;  %v1604_v2 = vld [vmem:[%s232_s17] sm:$0xff]  ;;  %s264_s22 = scalar_lea.vmem %s1626_s21, %s1304_s18  ;;  %s1640_s29 = scalar_lea.vmem %s1758_s2, %s1596_s14 }
  0x11   : > { %1368 = vmatpush3.msra.mxu0 %v1602_v1  ;;  %1375 = vmatpush3.msra.mxu1 %v1602_v1  ;;  %v265_v4 = vld [vmem:[%s264_s22] sm:$0x3]  ;;  %s372_s30 = scalar_lea.vmem %s1640_s29, %s1304_s18  ;;  %s1202_s4 = scalar_lea.vmem %s1626_s21, %s1306_s3 }
  0x12   : > { %1369 = vmatprep.subr.mxu0 %v1542_v0  ;;  %1376 = vmatprep.subr.mxu1 %v1542_v0  ;;  %v1307_v25 = vld [vmem:[%s1202_s4 + $0x2] sm:$0x3]  ;;  %s1206_s5 = scalar_lea.vmem %s1640_s29, %s1306_s3  ;;  %s1210_s7 = scalar_lea.vmem %s1626_s21, %s1311_s6 }
  0x13   : > { %1370 = vmatpush3.msra.mxu0 %v1604_v2  ;;  %1377 = vmatpush3.msra.mxu1 %v1604_v2  ;;  %v1312_v44 = vld [vmem:[%s1210_s7 + $0x4] sm:$0x3]  ;;  %s1214_s8 = scalar_lea.vmem %s1640_s29, %s1311_s6  ;;  %s1217_s14 = scalar_lea.vmem %s1626_s21, %s1316_s13 }
  0x14   : > { %v260_v3 = vld [vmem:[#allocation2] sm:$0x3]  ;;  %1381 = vmatprep.subr.mxu0 %v1542_v0  ;;  %1388 = vmatprep.subr.mxu1 %v1542_v0  ;;  %v261_v9 = vld [vmem:[#allocation3] sm:$0x3]  ;;  %v1317_v63 = vld [vmem:[%s1217_s14 + $0x6] sm:$0x3]  ;;  %s1220_s15 = scalar_lea.vmem %s1640_s29, %s1316_s13  ;;  %s1228_s22 = scalar_lea.vmem %s1626_s21, %s1323_s20 }
  0x15   : > { %1372 = vmatmul.mubr.msk.f32.vlgmr.msra.gmra.mxu0 %vm266_vm2, %v260_v3  ;;  %s1698_s17 = sshll.u32 %s695_s16, 1  ;;  %s1232_s27 = scalar_lea.vmem %s1640_s29, %s1323_s20 }
  0x16   : > { %1382 = vmatpush3.msra.mxu0 %v1602_v1  ;;  %1385 = vmatprep.mubr.msk.f32.mxu0 %vm1543_vm1, %v1542_v0  ;;  %s697_s18 = scalar_lea.vmem %s1626_s21, %s1698_s17  ;;  %s799_s19 = scalar_lea.vmem %s1640_s29, %s1698_s17 }
  0x17   : > { %1383 = vmatprep.subr.mxu0 %v1542_v0  ;;  %s1240_s3 = scalar_lea.vmem %s1640_s29, %s1328_s28  ;;  %s1333_s4 = smul.u32 4294967282, %s1532_s9 }
  0x18   : > { %1384 = vmatpush3.msra.mxu0 %v1604_v2 }
  0x19   : > { %1395 = vmatprep.subr.mxu0 %v1542_v0 }
  0xd5   : > { %v336_v5 = vpop.f32.mrf.mxu0 }
  0xd6   : > { %v340_v6 = vadd.f32 %v336_v5, %v265_v4 }
  0xd7   : > { %v1373_v7 = vpop.f32.mrf.mxu0 }
  0xd8   : > { %1454 = vtanh.f32 %v340_v6  ;;  %v341_v10 = vsub.f32 0.0, %v340_v6 }
  0xda   : > { %v342_v11 = vmul.f32 1.442695, %v341_v10 }
  0xdc   : > { %1456 = vpow2.f32 %v342_v11 }
  0xe5   : > { %v1455_v8 = vpop.eup %1454 }
  0xe6   : > { %353 = vrot.lane.b32.xlu0 %v1455_v8, %s1544_s23 }
  0xe9   : > { %v1457_v12 = vpop.eup %1456 }
  0xea   : > { %348 = vrot.lane.b32.xlu0 %v261_v9, %s1545_s24  ;;  %v344_v13 = vadd.f32 1.0, %v1457_v12 }
  0xec   : > { %1458 = vrcp.f32 %v344_v13 }
  0xf9   : > { %v1459_v14 = vpop.eup %1458 }
 0x158   : > { %v354_v15 = vpop.permute.xlu0 %353 }
 0x159   : > { %v356_v16 = vmul.f32 %v1459_v14, %v354_v15 }
 0x15b   : > { %358 = vrot.lane.b32.xlu1 %v356_v16, %s1545_s24 }
 0x15c   : > { %v349_v17 = vpop.permute.xlu0 %348 }
 0x15d   : > { %v351_v18 = vmul.f32 %v1459_v14, %v349_v17 }
 0x1cd   : > { %v359_v19 = vpop.permute.xlu1 %358 }
 0x1ce   : > { %v361_v20 = vadd.f32 %v359_v19, %v351_v18 }
 0x1d0   : > { %1460 = vtanh.f32 %v361_v20 }
 0x1dd   : > { %v1461_v21 = vpop.eup %1460 }
 0x1de   : > { %364 = vrot.lane.b32.xlu1 %v1461_v21, %s1546_s25  ;;  %v698_v21 = vld [vmem:[%s697_s18] sm:$0x3] }
 0x250   : > { %v365_v22 = vpop.permute.xlu1 %364 }
 0x251   : > { %v367_v23 = vmul.f32 %v1459_v14, %v365_v22 }
 0x253   : > { %369 = vrot.lane.b32.xlu0 %v367_v23, %s1547_s26 }
 0x2c5   : > { %v370_v24 = vpop.permute.xlu0 %369 }
 0x2c6   : > { %374 = vst.msk [vmem:[%s372_s30] sm:$0x3] %vm255_vm0, %v370_v24  ;;  %1379 = vmatmul.mubr.msk.f32.vlgmr.msra.gmra.mxu1 %vm266_vm2, %v370_v24  ;;  %s1236_s30 = scalar_lea.vmem %s1626_s21, %s1328_s28 }
 0x2c7   : > { %1389 = vmatpush3.msra.mxu1 %v1602_v1  ;;  %1392 = vmatprep.mubr.msk.f32.mxu1 %vm1543_vm1, %v1542_v0 }
 0x2c8   : > { %1390 = vmatprep.subr.mxu1 %v1542_v0 }
 0x2c9   : > { %1391 = vmatpush3.msra.mxu1 %v1604_v2 }
 0x2ca   : > { %1402 = vmatprep.subr.mxu1 %v1542_v0 }
 0x386   : > { %v448_v26 = vpop.f32.mrf.mxu1 }
 0x387   : > { %v452_v27 = vadd.f32 %v1307_v25, %v448_v26 }
 0x388   : > { %v1380_v28 = vpop.f32.mrf.mxu1 }
 0x389   : > { %1462 = vtanh.f32 %v452_v27  ;;  %v453_v30 = vsub.f32 0.0, %v452_v27 }
 0x38b   : > { %v454_v31 = vmul.f32 1.442695, %v453_v30 }
 0x38d   : > { %1464 = vpow2.f32 %v454_v31 }
 0x396   : > { %v1463_v29 = vpop.eup %1462 }
 0x397   : > { %461 = vrot.lane.b32.xlu1 %v1463_v29, %s1544_s23 }
 0x39a   : > { %v1465_v32 = vpop.eup %1464 }
 0x39b   : > { %v456_v33 = vadd.f32 1.0, %v1465_v32 }
 0x39d   : > { %1466 = vrcp.f32 %v456_v33 }
 0x3aa   : > { %v1467_v34 = vpop.eup %1466 }
 0x3ab   : > { %v459_v37 = vmul.f32 %v1467_v34, %v361_v20 }
 0x409   : > { %v462_v35 = vpop.permute.xlu1 %461 }
 0x40a   : > { %v464_v36 = vmul.f32 %v1467_v34, %v462_v35 }
 0x40c   : > { %466 = vrot.lane.b32.xlu0 %v464_v36, %s1545_s24 }
 0x47e   : > { %v467_v38 = vpop.permute.xlu0 %466 }
 0x47f   : > { %v469_v39 = vadd.f32 %v467_v38, %v459_v37 }
 0x481   : > { %1468 = vtanh.f32 %v469_v39 }
 0x48e   : > { %v1469_v40 = vpop.eup %1468 }
 0x48f   : > { %472 = vrot.lane.b32.xlu1 %v1469_v40, %s1546_s25  ;;  %v1324_v40 = vld [vmem:[%s1228_s22 + $0xa] sm:$0x3] }
 0x501   : > { %v473_v41 = vpop.permute.xlu1 %472 }
 0x502   : > { %v475_v42 = vmul.f32 %v1467_v34, %v473_v41 }
 0x504   : > { %477 = vrot.lane.b32.xlu0 %v475_v42, %s1547_s26 }
 0x576   : > { %v478_v43 = vpop.permute.xlu0 %477 }
 0x577   : > { %1310 = vst.msk [vmem:[%s1206_s5 + $0x2] sm:$0x3] %vm255_vm0, %v478_v43  ;;  %1386 = vmatmul.mubr.msk.f32.vlgmr.msra.gmra.mxu0 %vm266_vm2, %v478_v43  ;;  %s1244_s5 = scalar_lea.vmem %s1626_s21, %s1333_s4  ;;  %s1548_s21 = smov 112  }
 0x578   : > { %1396 = vmatpush3.msra.mxu0 %v1602_v1  ;;  %1399 = vmatprep.mubr.msk.f32.mxu0 %vm1543_vm1, %v1542_v0 }
 0x579   : > { %1397 = vmatprep.subr.mxu0 %v1542_v0 }
 0x57a   : > { %1398 = vmatpush3.msra.mxu0 %v1604_v2 }
 0x57b   : > { %1409 = vmatprep.subr.mxu0 %v1542_v0 }
 0x637   : > { %v555_v45 = vpop.f32.mrf.mxu0 }
 0x638   : > { %v559_v46 = vadd.f32 %v1312_v44, %v555_v45 }
 0x639   : > { %v1387_v47 = vpop.f32.mrf.mxu0 }
 0x63a   : > { %1470 = vtanh.f32 %v559_v46  ;;  %v560_v49 = vsub.f32 0.0, %v559_v46 }
 0x63c   : > { %v561_v50 = vmul.f32 1.442695, %v560_v49 }
 0x63e   : > { %1472 = vpow2.f32 %v561_v50 }
 0x647   : > { %v1471_v48 = vpop.eup %1470 }
 0x648   : > { %568 = vrot.lane.b32.xlu1 %v1471_v48, %s1544_s23 }
 0x64b   : > { %v1473_v51 = vpop.eup %1472 }
 0x64c   : > { %v563_v52 = vadd.f32 1.0, %v1473_v51 }
 0x64e   : > { %1474 = vrcp.f32 %v563_v52 }
 0x65b   : > { %v1475_v53 = vpop.eup %1474 }
 0x65c   : > { %v566_v56 = vmul.f32 %v1475_v53, %v469_v39 }
 0x6ba   : > { %v569_v54 = vpop.permute.xlu1 %568 }
 0x6bb   : > { %v571_v55 = vmul.f32 %v1475_v53, %v569_v54 }
 0x6bd   : > { %573 = vrot.lane.b32.xlu0 %v571_v55, %s1545_s24 }
 0x72f   : > { %v574_v57 = vpop.permute.xlu0 %573 }
 0x730   : > { %v576_v58 = vadd.f32 %v574_v57, %v566_v56  ;;  %v1329_v56 = vld [vmem:[%s1236_s30 + $0xc] sm:$0x3] }
 0x732   : > { %1476 = vtanh.f32 %v576_v58 }
 0x73f   : > { %v1477_v59 = vpop.eup %1476 }
 0x740   : > { %579 = vrot.lane.b32.xlu1 %v1477_v59, %s1546_s25 }
 0x7b2   : > { %v580_v60 = vpop.permute.xlu1 %579 }
 0x7b3   : > { %v582_v61 = vmul.f32 %v1475_v53, %v580_v60 }
 0x7b5   : > { %584 = vrot.lane.b32.xlu0 %v582_v61, %s1547_s26 }
 0x827   : > { %v585_v62 = vpop.permute.xlu0 %584 }
 0x828   : > { %1315 = vst.msk [vmem:[%s1214_s8 + $0x4] sm:$0x3] %vm255_vm0, %v585_v62  ;;  %1393 = vmatmul.mubr.msk.f32.vlgmr.msra.gmra.mxu1 %vm266_vm2, %v585_v62 }
 0x829   : > { %1403 = vmatpush3.msra.mxu1 %v1602_v1  ;;  %1406 = vmatprep.mubr.msk.f32.mxu1 %vm1543_vm1, %v1542_v0 }
 0x82a   : > { %1404 = vmatprep.subr.mxu1 %v1542_v0 }
 0x82b   : > { %1405 = vmatpush3.msra.mxu1 %v1604_v2 }
 0x82c   : > { %1416 = vmatprep.subr.mxu1 %v1542_v0 }
 0x8e8   : > { %v661_v3 = vpop.f32.mrf.mxu1 }
 0x8e9   : > { %v665_v4 = vadd.f32 %v1317_v63, %v661_v3 }
 0x8ea   : > { %v1394_v5 = vpop.f32.mrf.mxu1 }
 0x8eb   : > { %1478 = vtanh.f32 %v665_v4  ;;  %v666_v7 = vsub.f32 0.0, %v665_v4 }
 0x8ed   : > { %v667_v8 = vmul.f32 1.442695, %v666_v7 }
 0x8ef   : > { %1480 = vpow2.f32 %v667_v8 }
 0x8f8   : > { %v1479_v6 = vpop.eup %1478 }
 0x8f9   : > { %674 = vrot.lane.b32.xlu1 %v1479_v6, %s1544_s23 }
 0x8fc   : > { %v1481_v9 = vpop.eup %1480 }
 0x8fd   : > { %v669_v10 = vadd.f32 1.0, %v1481_v9 }
 0x8ff   : > { %1482 = vrcp.f32 %v669_v10 }
 0x90c   : > { %v1483_v11 = vpop.eup %1482 }
 0x90d   : > { %v672_v14 = vmul.f32 %v1483_v11, %v576_v58 }
 0x96b   : > { %v675_v12 = vpop.permute.xlu1 %674 }
 0x96c   : > { %v677_v13 = vmul.f32 %v1483_v11, %v675_v12 }
 0x96e   : > { %679 = vrot.lane.b32.xlu0 %v677_v13, %s1545_s24 }
 0x9e0   : > { %v680_v15 = vpop.permute.xlu0 %679 }
 0x9e1   : > { %v682_v16 = vadd.f32 %v680_v15, %v672_v14  ;;  %v1334_v14 = vld [vmem:[%s1244_s5 + $0xe] sm:$0x3] }
 0x9e3   : > { %1484 = vtanh.f32 %v682_v16 }
 0x9f0   : > { %v1485_v17 = vpop.eup %1484 }
 0x9f1   : > { %685 = vrot.lane.b32.xlu1 %v1485_v17, %s1546_s25 }
 0xa63   : > { %v686_v18 = vpop.permute.xlu1 %685 }
 0xa64   : > { %v688_v19 = vmul.f32 %v1483_v11, %v686_v18 }
 0xa66   : > { %690 = vrot.lane.b32.xlu0 %v688_v19, %s1547_s26 }
 0xad8   : > { %v691_v20 = vpop.permute.xlu0 %690 }
 0xad9   : > { %1320 = vst.msk [vmem:[%s1220_s15 + $0x6] sm:$0x3] %vm255_vm0, %v691_v20  ;;  %1400 = vmatmul.mubr.msk.f32.vlgmr.msra.gmra.mxu0 %vm266_vm2, %v691_v20 }
 0xada   : > { %1410 = vmatpush3.msra.mxu0 %v1602_v1  ;;  %1413 = vmatprep.mubr.msk.f32.mxu0 %vm1543_vm1, %v1542_v0 }
 0xadb   : > { %1411 = vmatprep.subr.mxu0 %v1542_v0 }
 0xadc   : > { %1412 = vmatpush3.msra.mxu0 %v1604_v2 }
 0xb99   : > { %v767_v22 = vpop.f32.mrf.mxu0 }
 0xb9a   : > { %v771_v23 = vadd.f32 %v767_v22, %v698_v21 }
 0xb9b   : > { %v1401_v24 = vpop.f32.mrf.mxu0 }
 0xb9c   : > { %1486 = vtanh.f32 %v771_v23  ;;  %v772_v26 = vsub.f32 0.0, %v771_v23 }
 0xb9e   : > { %v773_v27 = vmul.f32 1.442695, %v772_v26 }
 0xba0   : > { %1488 = vpow2.f32 %v773_v27 }
 0xba9   : > { %v1487_v25 = vpop.eup %1486 }
 0xbaa   : > { %780 = vrot.lane.b32.xlu1 %v1487_v25, %s1544_s23 }
 0xbad   : > { %v1489_v28 = vpop.eup %1488 }
 0xbae   : > { %v775_v29 = vadd.f32 1.0, %v1489_v28 }
 0xbb0   : > { %1490 = vrcp.f32 %v775_v29 }
 0xbbd   : > { %v1491_v30 = vpop.eup %1490 }
 0xbbe   : > { %v778_v33 = vmul.f32 %v1491_v30, %v682_v16 }
 0xc1c   : > { %v781_v31 = vpop.permute.xlu1 %780 }
 0xc1d   : > { %v783_v32 = vmul.f32 %v1491_v30, %v781_v31 }
 0xc1f   : > { %785 = vrot.lane.b32.xlu0 %v783_v32, %s1545_s24 }
 0xc91   : > { %v786_v34 = vpop.permute.xlu0 %785 }
 0xc92   : > { %v788_v35 = vadd.f32 %v786_v34, %v778_v33 }
 0xc94   : > { %1492 = vtanh.f32 %v788_v35 }
 0xca1   : > { %v1493_v36 = vpop.eup %1492 }
 0xca2   : > { %791 = vrot.lane.b32.xlu1 %v1493_v36, %s1546_s25 }
 0xd14   : > { %v792_v37 = vpop.permute.xlu1 %791 }
 0xd15   : > { %v794_v38 = vmul.f32 %v1491_v30, %v792_v37 }
 0xd17   : > { %796 = vrot.lane.b32.xlu0 %v794_v38, %s1547_s26 }
 0xd89   : > { %v797_v39 = vpop.permute.xlu0 %796 }
 0xd8a   : > { %800 = vst.msk [vmem:[%s799_s19] sm:$0x3] %vm255_vm0, %v797_v39  ;;  %1407 = vmatmul.mubr.msk.f32.vlgmr.msra.gmra.mxu1 %vm266_vm2, %v797_v39 }
 0xd8b   : > { %1417 = vmatpush3.msra.mxu1 %v1602_v1  ;;  %1420 = vmatprep.mubr.msk.f32.mxu1 %vm1543_vm1, %v1542_v0 }
 0xd8c   : > { %1418 = vmatprep.subr.mxu1 %v1542_v0 }
 0xd8d   : > { %1419 = vmatpush3.msra.mxu1 %v1604_v2 }
 0xe4a   : > { %v874_v41 = vpop.f32.mrf.mxu1 }
 0xe4b   : > { %v878_v42 = vadd.f32 %v1324_v40, %v874_v41 }
 0xe4c   : > { %v1408_v43 = vpop.f32.mrf.mxu1 }
 0xe4d   : > { %1494 = vtanh.f32 %v878_v42  ;;  %v879_v45 = vsub.f32 0.0, %v878_v42 }
 0xe4f   : > { %v880_v46 = vmul.f32 1.442695, %v879_v45 }
 0xe51   : > { %1496 = vpow2.f32 %v880_v46 }
 0xe5a   : > { %v1495_v44 = vpop.eup %1494 }
 0xe5b   : > { %887 = vrot.lane.b32.xlu1 %v1495_v44, %s1544_s23 }
 0xe5e   : > { %v1497_v1 = vpop.eup %1496 }
 0xe5f   : > { %v882_v47 = vadd.f32 1.0, %v1497_v1 }
 0xe61   : > { %1498 = vrcp.f32 %v882_v47 }
 0xe6e   : > { %v1499_v0 = vpop.eup %1498 }
 0xe6f   : > { %v885_v49 = vmul.f32 %v1499_v0, %v788_v35 }
 0xecd   : > { %v888_v48 = vpop.permute.xlu1 %887 }
 0xece   : > { %v890_v2 = vmul.f32 %v1499_v0, %v888_v48 }
 0xed0   : > { %892 = vrot.lane.b32.xlu0 %v890_v2, %s1545_s24 }
 0xf42   : > { %v893_v50 = vpop.permute.xlu0 %892 }
 0xf43   : > { %v895_v51 = vadd.f32 %v893_v50, %v885_v49 }
 0xf45   : > { %1500 = vtanh.f32 %v895_v51 }
 0xf52   : > { %v1501_v52 = vpop.eup %1500 }
 0xf53   : > { %898 = vrot.lane.b32.xlu1 %v1501_v52, %s1546_s25 }
 0xfc5   : > { %v899_v53 = vpop.permute.xlu1 %898 }
 0xfc6   : > { %v901_v54 = vmul.f32 %v1499_v0, %v899_v53 }
 0xfc8   : > { %903 = vrot.lane.b32.xlu0 %v901_v54, %s1547_s26 }
0x103a   : > { %v904_v55 = vpop.permute.xlu0 %903 }
0x103b   : > { %1327 = vst.msk [vmem:[%s1232_s27 + $0xa] sm:$0x3] %vm255_vm0, %v904_v55  ;;  %1414 = vmatmul.mubr.msk.f32.vlgmr.msra.gmra.mxu0 %vm266_vm2, %v904_v55 }
0x10fb   : > { %v981_v57 = vpop.f32.mrf.mxu0 }
0x10fc   : > { %v985_v58 = vadd.f32 %v1329_v56, %v981_v57 }
0x10fd   : > { %v1415_v59 = vpop.f32.mrf.mxu0 }
0x10fe   : > { %1502 = vtanh.f32 %v985_v58  ;;  %v986_v61 = vsub.f32 0.0, %v985_v58 }
0x1100   : > { %v987_v62 = vmul.f32 1.442695, %v986_v61 }
0x1102   : > { %1504 = vpow2.f32 %v987_v62 }
0x110b   : > { %v1503_v60 = vpop.eup %1502 }
0x110c   : > { %994 = vrot.lane.b32.xlu1 %v1503_v60, %s1544_s23 }
0x110f   : > { %v1505_v63 = vpop.eup %1504 }
0x1110   : > { %v989_v3 = vadd.f32 1.0, %v1505_v63 }
0x1112   : > { %1506 = vrcp.f32 %v989_v3 }
0x111f   : > { %v1507_v4 = vpop.eup %1506 }
0x1120   : > { %v992_v7 = vmul.f32 %v1507_v4, %v895_v51 }
0x117e   : > { %v995_v5 = vpop.permute.xlu1 %994 }
0x117f   : > { %v997_v6 = vmul.f32 %v1507_v4, %v995_v5 }
0x1181   : > { %999 = vrot.lane.b32.xlu0 %v997_v6, %s1545_s24 }
0x11f3   : > { %v1000_v8 = vpop.permute.xlu0 %999 }
0x11f4   : > { %v1002_v9 = vadd.f32 %v1000_v8, %v992_v7 }
0x11f6   : > { %1508 = vtanh.f32 %v1002_v9 }
0x1203   : > { %v1509_v10 = vpop.eup %1508 }
0x1204   : > { %1005 = vrot.lane.b32.xlu1 %v1509_v10, %s1546_s25 }
0x1276   : > { %v1006_v11 = vpop.permute.xlu1 %1005 }
0x1277   : > { %v1008_v12 = vmul.f32 %v1507_v4, %v1006_v11 }
0x1279   : > { %1010 = vrot.lane.b32.xlu0 %v1008_v12, %s1547_s26 }
0x12eb   : > { %v1011_v13 = vpop.permute.xlu0 %1010 }
0x12ec   : > { %1332 = vst.msk [vmem:[%s1240_s3 + $0xc] sm:$0x3] %vm255_vm0, %v1011_v13  ;;  %1421 = vmatmul.mubr.msk.f32.vlgmr.msra.gmra.mxu1 %vm266_vm2, %v1011_v13 }
0x13ac   : > { %v1088_v15 = vpop.f32.mrf.mxu1 }
0x13ad   : > { %v1092_v16 = vadd.f32 %v1334_v14, %v1088_v15 }
0x13ae   : > { %v1422_v17 = vpop.f32.mrf.mxu1 }
0x13af   : > { %1510 = vtanh.f32 %v1092_v16  ;;  %v1093_v19 = vsub.f32 0.0, %v1092_v16 }
0x13b1   : > { %v1094_v20 = vmul.f32 1.442695, %v1093_v19 }
0x13b3   : > { %1512 = vpow2.f32 %v1094_v20 }
0x13bc   : > { %v1511_v18 = vpop.eup %1510 }
0x13bd   : > { %1101 = vrot.lane.b32.xlu1 %v1511_v18, %s1544_s23  ;;  %s1248_s23 = scalar_lea.vmem %s1640_s29, %s1333_s4 }
0x13c0   : > { %v1513_v21 = vpop.eup %1512 }
0x13c1   : > { %v1096_v22 = vadd.f32 1.0, %v1513_v21 }
0x13c3   : > { %1514 = vrcp.f32 %v1096_v22 }
0x13d0   : > { %v1515_v23 = vpop.eup %1514 }
0x13d1   : > { %v1099_v26 = vmul.f32 %v1515_v23, %v1002_v9 }
0x142f   : > { %v1102_v24 = vpop.permute.xlu1 %1101 }
0x1430   : > { %v1104_v25 = vmul.f32 %v1515_v23, %v1102_v24 }
0x1432   : > { %1106 = vrot.lane.b32.xlu0 %v1104_v25, %s1545_s24 }
0x14a4   : > { %v1107_v27 = vpop.permute.xlu0 %1106 }
0x14a5   : > { %v1109_v28 = vadd.f32 %v1107_v27, %v1099_v26 }
0x14a7   : > { %1516 = vtanh.f32 %v1109_v28 }
0x14b4   : > { %v1517_v29 = vpop.eup %1516 }
0x14b5   : > { %1112 = vrot.lane.b32.xlu1 %v1517_v29, %s1546_s25 }
0x14b9   : > { %1124 = vrot.lane.b32.xlu1 %v1109_v28, %s1548_s21 }
0x1527   : > { %v1113_v30 = vpop.permute.xlu1 %1112 }
0x1528   : > { %v1115_v31 = vmul.f32 %v1515_v23, %v1113_v30 }
0x152a   : > { %1117 = vrot.lane.b32.xlu0 %v1115_v31, %s1547_s26 }
0x152b   : > { %v1125_v32 = vpop.permute.xlu1 %1124 }
0x152c   : > { %1127 = vst.msk [vmem:[#allocation3] sm:$0x3] %vm255_vm0, %v1125_v32 }
0x159c   : > { %v1118_v33 = vpop.permute.xlu0 %1117 }
0x159d   : > { %1337 = vst.msk [vmem:[%s1248_s23 + $0xe] sm:$0x3] %vm255_vm0, %v1118_v33  ;;  %1122 = vst.msk [vmem:[#allocation2] sm:$0x3] %vm255_vm0, %v1118_v33 }
0x159e PF: > { %s12_s11 = sadd.s32 1, %s1540_s11   ;;  %s1759_s9 = smov %s1536_s10 }
0x159f   : > { %p9_p5 = scmp.ge.s32.totalorder %s12_s11, 4   ;;  %s1760_s10 = smov %s1762_s12 }
0x15a1   :  { %11 = sbr.rel (!%p9_p5) target bundleno = 2 (0x2), region = 81 }

</bundles_post_ra>
